<compile_context>
chip_gen: v7x
topology: tpu7x:2x2x1
jax: 0.10.0
libtpu: 0.0.40
codegen_flags: <defaults>
</compile_context>

<pallas_src>
import functools

import jax
import jax.numpy as jnp
from jax.experimental import pallas as pl
from jax.experimental.pallas import tpu as pltpu


def _round_up(x, m):
    return (x + m - 1) // m * m


def _basis_columns(t, degree, knots):
    """Truncated power basis columns of t (t shape (TB, 1)); list of d (TB, 1)."""
    num_basis = degree + 1 + len(knots)
    cols = []
    for k in range(num_basis):
        if k == 0:
            cols.append(jnp.ones_like(t))
        elif k <= degree:
            cols.append(t ** k)
        else:
            # NOTE: the original degree==1 branch indexes knots[k - degree],
            # which runs off the end of the knot list (IndexError); use the
            # intended k - degree - 1 indexing for every degree.
            r = jnp.maximum(t - knots[k - degree - 1], 0.0)
            cols.append(r if degree == 1 else r ** degree)
    return cols


def _dynamic_fc_kernel(x_ref, w_ref, out_ref, *, degree, knots, act, islastlayer):
    x = x_ref[...].astype(jnp.float32)          # (TB, C), C = 1 + ind, lane-dense
    t = x[:, 0:1]                               # (TB, 1) treatment

    # x' : lane 0 (treatment) replaced by 1.0 -> acts as the bias contraction row.
    lane = jax.lax.broadcasted_iota(jnp.int32, x.shape, 1)
    x1 = jnp.where(lane == 0, jnp.float32(1.0), x)

    basis = _basis_columns(t, degree, knots)    # d columns of (TB, 1)

    # Fused LHS for ONE MXU matmul: [ b0*x' | b1*x' | ... | b_{d-1}*x' ]
    # (b0 == 1 so the first piece is just x'). The matching weight matrix built
    # in the wrapper has per-k row blocks [bias_k ; W_k], so the whole spline
    # accumulation feats@W_k + bias_k, scaled by b_k and summed over k, is a
    # single (TB, d*C) @ (d*C, OUT) contraction.
    lhs = jnp.concatenate([x1] + [bk * x1 for bk in basis[1:]], axis=1)

    acc = jnp.dot(lhs.astype(w_ref.dtype), w_ref[...],
                  preferred_element_type=jnp.float32)   # (TB, OUT)

    if act == "relu":
        acc = jnp.maximum(acc, 0.0)
    elif act == "tanh":
        acc = jnp.tanh(acc)
    elif act == "sigmoid":
        acc = jax.nn.sigmoid(acc)

    if not islastlayer:
        # Column 0 of the (zero weight column) output carries the raw treatment.
        # Required even though the weight column is zero (e.g. sigmoid(0)=0.5).
        col = jax.lax.broadcasted_iota(jnp.int32, acc.shape, 1)
        acc = jnp.where(col == 0, t, acc)

    out_ref[...] = acc.astype(out_ref.dtype)


def dynamic_fc(x, weight, bias, *, degree, knots, act="relu", isbias=True,
               islastlayer=False, row_tile=2048,
               compute_dtype=jnp.float32, out_dtype=jnp.float32):
    """Pallas forward of Dynamic_FC.

    x:      [B, 1 + ind]   (column 0 = treatment, rest = features)
    weight: [ind, outd, d] with d = degree + 1 + len(knots)
    bias:   [outd, d] or None
    """
    knots = tuple(float(v) for v in knots)
    assert isinstance(degree, int) and degree >= 1, "degree must be a positive int"
    batch, c_in = x.shape
    ind, outd, d = weight.shape
    assert d == degree + 1 + len(knots), "weight trailing dim must equal num_of_basis"
    assert c_in == ind + 1, "x must be [B, 1 + ind]"

    C = ind + 1
    out_cols = outd if islastlayer else outd + 1
    k_aug = d * C

    # --- one-time parameter re-layout: fused [d*C, out_cols] matrix -----------
    # per-k block rows: [ bias[:,k] ; weight[:, :, k] ]  (treatment lane carries 1.0)
    w_k = jnp.transpose(weight.astype(jnp.float32), (2, 0, 1))            # (d, ind, outd)
    if isbias and bias is not None:
        b_k = jnp.transpose(bias.astype(jnp.float32), (1, 0))[:, None, :]  # (d, 1, outd)
    else:
        b_k = jnp.zeros((d, 1, outd), jnp.float32)
    w_aug = jnp.concatenate([b_k, w_k], axis=1).reshape(k_aug, outd)
    if not islastlayer:
        # Leading zero output column; the treatment value is merged in-kernel.
        w_aug = jnp.pad(w_aug, ((0, 0), (1, 0)))
    w_aug = w_aug.astype(compute_dtype)

    x = x.astype(compute_dtype)   # single lane-dense input stream, no wrapper split

    # --- row tiling ------------------------------------------------------------
    # Large tiles amortize the ~0.35us/step overhead; clamp so the grid has at
    # least 2 blocks when batch > 8 (v7x has 2 TensorCores to shard "parallel").
    row_tile = min(int(row_tile), _round_up(pl.cdiv(batch, 2), 8))
    row_tile = max(8, (row_tile // 8) * 8)
    b_pad = _round_up(batch, row_tile)
    if b_pad != batch:
        x = jnp.pad(x, ((0, b_pad - batch), (0, 0)))
    grid = (b_pad // row_tile,)

    # --- scoped VMEM budget (cap below v7x's 64 MiB physical VMEM) -------------
    lanes = 128
    in_b = jnp.dtype(compute_dtype).itemsize
    out_b = jnp.dtype(out_dtype).itemsize
    est = 2 * row_tile * _round_up(C, lanes) * in_b                       # x blocks (2-buf)
    est += 2 * row_tile * _round_up(out_cols, lanes) * out_b              # out blocks (2-buf)
    est += 2 * _round_up(k_aug, 8) * _round_up(out_cols, lanes) * in_b    # resident weights
    est += row_tile * _round_up(k_aug, lanes) * 4                         # lhs temporary
    est += (d + 2) * row_tile * _round_up(max(C, out_cols), lanes) * 4    # basis/acc temps
    vmem_limit = int(min(max(2 * est, 16 << 20), 48 << 20))

    kernel = functools.partial(_dynamic_fc_kernel, degree=degree, knots=knots,
                               act=act, islastlayer=islastlayer)

    out = pl.pallas_call(
        kernel,
        out_shape=jax.ShapeDtypeStruct((b_pad, out_cols), out_dtype),
        grid_spec=pltpu.PrefetchScalarGridSpec(
            num_scalar_prefetch=0,
            grid=grid,
            in_specs=[
                pl.BlockSpec((row_tile, C), lambda i: (i, 0)),        # x (whole rows)
                pl.BlockSpec((k_aug, out_cols), lambda i: (0, 0)),    # fused weights (resident)
            ],
            out_specs=pl.BlockSpec((row_tile, out_cols), lambda i: (i, 0)),
        ),
        compiler_params=pltpu.CompilerParams(
            dimension_semantics=("parallel",),
            vmem_limit_bytes=vmem_limit,
        ),
    )(x, w_aug)

    if b_pad != batch:
        out = out[:batch]
    return out


def _reference_dynamic_fc(x, weight, bias, *, degree, knots, act, isbias, islastlayer):
    """Plain-JAX reference matching the PyTorch Dynamic_FC.forward."""
    feats = x[:, 1:]
    t = x[:, 0]
    d = degree + 1 + len(knots)
    cols = []
    for k in range(d):
        if k == 0:
            cols.append(jnp.ones_like(t))
        elif k <= degree:
            cols.append(t ** k)
        else:
            r = jnp.maximum(t - knots[k - degree - 1], 0.0)
            cols.append(r if degree == 1 else r ** degree)
    basis = jnp.stack(cols, axis=1)                                        # (B, d)
    xfw = jnp.einsum("iok,bi->bok", weight, feats, precision="highest")    # (B, outd, d)
    out = jnp.sum(xfw * basis[:, None, :], axis=2)
    if isbias and bias is not None:
        out = out + jnp.einsum("bk,ok->bo", basis, bias, precision="highest")
    if act == "relu":
        out = jnp.maximum(out, 0.0)
    elif act == "tanh":
        out = jnp.tanh(out)
    elif act == "sigmoid":
        out = jax.nn.sigmoid(out)
    if not islastlayer:
        out = jnp.concatenate([t[:, None], out], axis=1)
    return out


if __name__ == "__main__":
    key = jax.random.PRNGKey(0)
    k_x, k_t, k_w, k_b = jax.random.split(key, 4)

    batch, ind, outd = 32, 8, 16
    degree = 2
    knots = (0.33, 0.66)
    d = degree + 1 + len(knots)

    # Column 0 = treatment in [0,1], columns 1: = features.
    x_treat = jax.random.uniform(k_t, (batch, 1), jnp.float32)
    x_feat = jax.random.normal(k_x, (batch, ind), jnp.float32)
    x = jnp.concatenate([x_treat, x_feat], axis=1)

    # Parameters as in the module (torch.rand -> uniform [0,1)).
    weight = jax.random.uniform(k_w, (ind, outd, d), jnp.float32)
    bias = jax.random.uniform(k_b, (outd, d), jnp.float32)

    # Hidden layer: relu + treatment pass-through column.
    out = dynamic_fc(x, weight, bias, degree=degree, knots=knots, act="relu",
                     isbias=True, islastlayer=False)
    out = jax.block_until_ready(out)
    ref = _reference_dynamic_fc(x, weight, bias, degree=degree, knots=knots,
                                act="relu", isbias=True, islastlayer=False)
    assert out.shape == ref.shape == (batch, outd + 1), (out.shape, ref.shape)
    assert jnp.allclose(out, ref, atol=1e-4, rtol=1e-4), \
        float(jnp.max(jnp.abs(out - ref)))

    # Last layer: sigmoid, no bias, no pass-through column.
    out2 = dynamic_fc(x, weight, None, degree=degree, knots=knots, act="sigmoid",
                      isbias=False, islastlayer=True)
    out2 = jax.block_until_ready(out2)
    ref2 = _reference_dynamic_fc(x, weight, None, degree=degree, knots=knots,
                                 act="sigmoid", isbias=False, islastlayer=True)
    assert out2.shape == ref2.shape == (batch, outd), (out2.shape, ref2.shape)
    assert jnp.allclose(out2, ref2, atol=1e-4, rtol=1e-4), \
        float(jnp.max(jnp.abs(out2 - ref2)))

    print("KERNEL_OK")
</pallas_src>

<mosaic_0001>
module attributes {stable_mosaic.version = 11 : i64} {
  func.func @_dynamic_fc_kernel(%arg0: i32, %arg1: memref<16x9xf32, #tpu.memory_space<vmem>>, %arg2: memref<45x17xf32, #tpu.memory_space<vmem>>, %arg3: memref<16x17xf32, #tpu.memory_space<vmem>>) attributes {dimension_semantics = [#tpu.dimension_semantics<parallel>], iteration_bounds = array<i64: 2>, scalar_prefetch = 0 : i64, scratch_operands = 0 : i64, tpu.core_type = #tpu.core_type<tc>, window_params = [{transform_indices = @transform_0, window_bounds = array<i64: 16, 9>}, {pipeline_mode = #tpu.pipeline_mode<synchronous>, transform_indices = @transform_1, window_bounds = array<i64: 45, 17>}, {transform_indices = @transform_2, window_bounds = array<i64: 16, 17>}]} {
    %c0 = arith.constant 0 : index
    %c0_0 = arith.constant 0 : index
    %0 = vector.load %arg1[%c0, %c0_0] : memref<16x9xf32, #tpu.memory_space<vmem>>, vector<16x9xf32>
    %1 = vector.extract_strided_slice %0 {offsets = [0, 0], sizes = [16, 1], strides = [1, 1]} : vector<16x9xf32> to vector<16x1xf32>
    %2 = tpu.iota {dimensions = array<i32: 1>} : vector<16x9xi32>
    %c0_i32 = arith.constant 0 : i32
    %3 = vector.broadcast %c0_i32 : i32 to vector<16x9xi32>
    %4 = arith.cmpi eq, %2, %3 : vector<16x9xi32>
    %cst = arith.constant 1.000000e+00 : f32
    %5 = vector.broadcast %cst : f32 to vector<16x9xf32>
    %6 = arith.select %4, %5, %0 : vector<16x9xi1>, vector<16x9xf32>
    %7 = arith.mulf %1, %1 : vector<16x1xf32>
    %cst_1 = arith.constant 3.300000e-01 : f32
    %8 = vector.broadcast %cst_1 : f32 to vector<16x1xf32>
    %9 = arith.subf %1, %8 : vector<16x1xf32>
    %cst_2 = arith.constant 0.000000e+00 : f32
    %10 = vector.broadcast %cst_2 : f32 to vector<16x1xf32>
    %11 = arith.maximumf %9, %10 : vector<16x1xf32>
    %12 = arith.mulf %11, %11 : vector<16x1xf32>
    %cst_3 = arith.constant 6.600000e-01 : f32
    %13 = vector.broadcast %cst_3 : f32 to vector<16x1xf32>
    %14 = arith.subf %1, %13 : vector<16x1xf32>
    %cst_4 = arith.constant 0.000000e+00 : f32
    %15 = vector.broadcast %cst_4 : f32 to vector<16x1xf32>
    %16 = arith.maximumf %14, %15 : vector<16x1xf32>
    %17 = arith.mulf %16, %16 : vector<16x1xf32>
    %18 = vector.broadcast %1 : vector<16x1xf32> to vector<16x9xf32>
    %19 = arith.mulf %18, %6 : vector<16x9xf32>
    %20 = vector.broadcast %7 : vector<16x1xf32> to vector<16x9xf32>
    %21 = arith.mulf %20, %6 : vector<16x9xf32>
    %22 = vector.broadcast %12 : vector<16x1xf32> to vector<16x9xf32>
    %23 = arith.mulf %22, %6 : vector<16x9xf32>
    %24 = vector.broadcast %17 : vector<16x1xf32> to vector<16x9xf32>
    %25 = arith.mulf %24, %6 : vector<16x9xf32>
    %26 = tpu.concatenate %6, %19, %21, %23, %25 in 1 : vector<16x9xf32>, vector<16x9xf32>, vector<16x9xf32>, vector<16x9xf32>, vector<16x9xf32> -> vector<16x45xf32>
    %c0_5 = arith.constant 0 : index
    %c0_6 = arith.constant 0 : index
    %27 = vector.load %arg2[%c0_5, %c0_6] : memref<45x17xf32, #tpu.memory_space<vmem>>, vector<45x17xf32>
    %cst_7 = arith.constant dense<0.000000e+00> : vector<16x17xf32>
    %28 = tpu.matmul %26, %27, %cst_7 {dimension_numbers = #tpu.dot_dimension_numbers<[1], [0], [0], [1], [0, 0, 1, 1], [], []>} : vector<16x45xf32>, vector<45x17xf32>, vector<16x17xf32> -> vector<16x17xf32>
    %cst_8 = arith.constant 0.000000e+00 : f32
    %29 = vector.broadcast %cst_8 : f32 to vector<16x17xf32>
    %30 = arith.maximumf %28, %29 : vector<16x17xf32>
    %31 = tpu.iota {dimensions = array<i32: 1>} : vector<16x17xi32>
    %c0_i32_9 = arith.constant 0 : i32
    %32 = vector.broadcast %c0_i32_9 : i32 to vector<16x17xi32>
    %33 = arith.cmpi eq, %31, %32 : vector<16x17xi32>
    %34 = vector.shape_cast %1 : vector<16x1xf32> to vector<16x1xf32>
    %35 = vector.broadcast %34 : vector<16x1xf32> to vector<16x17xf32>
    %36 = arith.select %33, %35, %30 : vector<16x17xi1>, vector<16x17xf32>
    %c0_10 = arith.constant 0 : index
    %c0_11 = arith.constant 0 : index
    %37 = vector.load %arg3[%c0_10, %c0_11] : memref<16x17xf32, #tpu.memory_space<vmem>>, vector<16x17xf32>
    tpu.vector_store %arg3[%c0_10, %c0_11], %36 {strides = array<i32>} : memref<16x17xf32, #tpu.memory_space<vmem>>, vector<16x17xf32>,
    return
  }
  func.func @transform_0(%arg0: i32) -> (i32, i32) {
    %c0_i32 = arith.constant 0 : i32
    %c0_i32_0 = arith.constant 0 : i32
    return %arg0, %c0_i32 : i32, i32
  }
  func.func @transform_1(%arg0: i32) -> (i32, i32) {
    %c0_i32 = arith.constant 0 : i32
    %c0_i32_0 = arith.constant 0 : i32
    %c0_i32_1 = arith.constant 0 : i32
    return %c0_i32, %c0_i32_0 : i32, i32
  }
  func.func @transform_2(%arg0: i32) -> (i32, i32) {
    %c0_i32 = arith.constant 0 : i32
    %c0_i32_0 = arith.constant 0 : i32
    return %arg0, %c0_i32 : i32, i32
  }
}

</mosaic_0001>

<bundles_post_ra>
// kernel: tpu_custom_call.1
= control target key start
LH: loop header
LB: loop body
LE: loop exit
PB: predicated region body
PF: predicated region fallthrough
CT: control target
= control target key end

     0   :  { %s515_s9 = smov 0   ;;  %s572_s0 = inlined_call_operand.vmem [shape: f32[32,9], index: 0, kind: input, shape index: {}]   ;;  %s573_s1 = inlined_call_operand.vmem [shape: f32[45,17], index: 1, kind: input, shape index: {}]   ;;  %s574_s2 = inlined_call_operand.vmem [shape: f32[32,17], index: 2, kind: output, shape index: {}]  }
   0x1 LB: > { %s415_s10 = sadd.s32 4294967295, %s492_s9   ;;  %p419_p0 = scmp.ge.s32.totalorder %s492_s9, 1  ;;  %s492_s9 = sphi %s515_s9, %s12_s9  }
   0x2   : > { %p113_p1 = scmp.lt.s32.totalorder %s492_s9, 3 }
   0x4   : > { %p114_p2 = pnand %p419_p0, %p113_p1 }
   0x5   : > { %s420_s11 = sshll.u32 (!%p114_p2), %s415_s10, 1  ;;  %v494_v0 = vmov (!%p114_p2), 0   ;;  %v149_v17 = vlaneseq (!%p114_p2)  ;;  %v260_v19 = vld [vmem:[%s573_s1] sm:$0xff] (!%p114_p2)  ;;  %v261_v20 = vld [vmem:[%s573_s1 + $0x8] sm:$0xff] (!%p114_p2)  ;;  %v262_v22 = vld [vmem:[%s573_s1 + $0x10] sm:$0xff] (!%p114_p2)  ;;  %vm273_vm1 = vcmask (!%p114_p2), 1044480  }
   0x6   : > { %117 = sbr.rel (%p114_p2) target bundleno = 496 (0x1f0), region = 28  ;;  %484 = vset.pattern.permute.xlu0 (!%p114_p2), %v494_v0  ;;  %p136_p3 = scmp.lt.s32.totalorder (!%p114_p2), %s420_s11, 3  ;;  %485 = vset.pattern.permute.xlu1 (!%p114_p2), %v494_v0  ;;  %v456_v21 = vpack.c.bf16 (!%p114_p2), %v261_v20, %v260_v19  ;;  %v263_v23 = vld [vmem:[%s573_s1 + $0x18] sm:$0xff] (!%p114_p2)  ;;  %v264_v27 = vld [vmem:[%s573_s1 + $0x20] sm:$0xff] (!%p114_p2)  ;;  %v265_v28 = vld [vmem:[%s573_s1 + $0x28] sm:$0x1f] (!%p114_p2) }
   0x7   : > { %v531_v18 = vand.u32 (!%p114_p2), 127, %v149_v17  ;;  %v460_v24 = vpack.c.bf16 (!%p114_p2), %v263_v23, %v262_v22  ;;  %v464_v30 = vpack.c.bf16 (!%p114_p2), %v265_v28, %v264_v27  ;;  %vm495_vm2 = vmmov (!%p114_p2), 1   ;;  %s496_s28 = smov (!%p114_p2), 9   ;;  %s497_s29 = smov (!%p114_p2), 18  }
   0x8   : > { %457 = vmatprep.subr.bf16.mxu0 (!%p114_p2), %v456_v21  ;;  %vm465_vm3 = vmpackc.low (!%p114_p2), %vm273_vm1, %vm495_vm2  ;;  %s498_s30 = smov (!%p114_p2), 27   ;;  %s499_s3 = smov (!%p114_p2), 36   ;;  %vm248_vm4 = vcmask (!%p114_p2), 72704   ;;  %vm251_vm5 = vcmask (!%p114_p2), 146432   ;;  %vm254_vm6 = vcmask (!%p114_p2), 220160   ;;  %vm257_vm7 = vcmask (!%p114_p2), 293888  }
   0x9   : > { %vm151_vm0 = vcmp.eq.s32.totalorder (!%p114_p2), %v531_v18, 0  ;;  %459 = vmatpush3.bf16.msra.mxu0 (!%p114_p2), %v456_v21  ;;  %vm266_vm8 = vcmask (!%p114_p2), 367616   ;;  %vm356_vm9 = vcmask (!%p114_p2), 138240  }
   0xa   : > { %461 = vmatprep.subr.bf16.mxu0 (!%p114_p2), %v460_v24 }
   0xd   : > { %s576_s11 = smov (!%p136_p3, %s420_s11), 3  ;;  %463 = vmatpush3.bf16.msra.mxu0 %v460_v24 }
   0xe   : > { %s421_s12 = sshll.u32 %s576_s11, 3  ;;  %466 = vmatprep.subr.msk.bf16.mxu0 %vm465_vm3, %v464_v30 }
   0xf   : > { %s139_s15 = scalar_lea.vmem %s572_s0, %s421_s12  ;;  %s145_s6 = scalar_lea.vmem %s574_s2, %s421_s12 }
  0x10   : > { %v147_v1 = vld [vmem:[%s139_s15] sm:$0xff]  ;;  %v148_v2 = vld [vmem:[%s139_s15 + $0x8] sm:$0xff] }
  0x11   : > { %170 = vperm.xlu0 %484, %v147_v1   ;;  %v154_v3 = vmul.f32 %v147_v1, %v147_v1  ;;  %v424_v4 = vadd.f32 -0.33, %v147_v1  ;;  %v425_v5 = vadd.f32 -0.33, %v148_v2  ;;  %v426_v6 = vadd.f32 -0.66, %v147_v1  ;;  %469 = vmatpush3.bf16.msk.msra.mxu0 %vm465_vm3, %v464_v30 }
  0x12   : > { %v155_v7 = vmul.f32 %v148_v2, %v148_v2  ;;  %v427_v10 = vadd.f32 -0.66, %v148_v2  ;;  %v152_v25 = vsel %vm151_vm0, 1.0, %v147_v1  ;;  %v153_v32 = vsel %vm151_vm0, 1.0, %v148_v2 }
  0x13   : > { %182 = vperm.xlu1 %485, %v154_v3   ;;  %v158_v8 = vmax.f32 %v424_v4, 0.0  ;;  %v159_v9 = vmax.f32 %v425_v5, 0.0  ;;  %v164_v12 = vmax.f32 %v426_v6, 0.0 }
  0x14   : > { %v165_v14 = vmax.f32 %v427_v10, 0.0 }
  0x15   : > { %175 = vperm.xlu0 %484, %v148_v2   ;;  %v160_v11 = vmul.f32 %v158_v8, %v158_v8  ;;  %v161_v13 = vmul.f32 %v159_v9, %v159_v9  ;;  %v166_v15 = vmul.f32 %v164_v12, %v164_v12 }
  0x16   : > { %v167_v16 = vmul.f32 %v165_v14, %v165_v14 }
  0x17   : > { %187 = vperm.xlu1 %485, %v155_v7  }
  0x19   : > { %194 = vperm.xlu0 %484, %v160_v11  }
  0x1b   : > { %199 = vperm.xlu1 %485, %v161_v13  }
  0x1d   : > { %206 = vperm.xlu0 %484, %v166_v15  }
  0x1f   : > { %211 = vperm.xlu1 %485, %v167_v16  }
  0x90   : > { %v548_v26 = vpop.permute.xlu0 %170 }
  0x91   : > { %v178_v29 = vmul.f32 %v548_v26, %v152_v25 }
  0x92   : > { %v183_v31 = vpop.permute.xlu1 %182 }
  0x93   : > { %v190_v33 = vmul.f32 %v183_v31, %v152_v25  ;;  %218 = vrot.lane.b32.xlu0 %v178_v29, %s496_s28 }
  0x94   : > { %v176_v34 = vpop.permute.xlu0 %175 }
  0x95   : > { %v179_v35 = vmul.f32 %v176_v34, %v153_v32 }
  0x96   : > { %v188_v36 = vpop.permute.xlu1 %187 }
  0x97   : > { %220 = vrot.lane.b32.xlu1 %v179_v35, %s496_s28  ;;  %226 = vrot.lane.b32.xlu0 %v190_v33, %s497_s29  ;;  %v191_v38 = vmul.f32 %v188_v36, %v153_v32 }
  0x98   : > { %v195_v37 = vpop.permute.xlu0 %194 }
  0x99   : > { %v202_v39 = vmul.f32 %v195_v37, %v152_v25 }
  0x9a   : > { %v200_v40 = vpop.permute.xlu1 %199 }
  0x9b   : > { %228 = vrot.lane.b32.xlu1 %v191_v38, %s497_s29  ;;  %234 = vrot.lane.b32.xlu0 %v202_v39, %s498_s30  ;;  %v203_v42 = vmul.f32 %v200_v40, %v153_v32 }
  0x9c   : > { %v207_v41 = vpop.permute.xlu0 %206 }
  0x9d   : > { %v214_v43 = vmul.f32 %v207_v41, %v152_v25 }
  0x9e   : > { %v212_v44 = vpop.permute.xlu1 %211 }
  0x9f   : > { %236 = vrot.lane.b32.xlu1 %v203_v42, %s498_s30  ;;  %242 = vrot.lane.b32.xlu0 %v214_v43, %s499_s3  ;;  %v215_v45 = vmul.f32 %v212_v44, %v153_v32 }
  0xa3   : > { %244 = vrot.lane.b32.xlu1 %v215_v45, %s499_s3 }
 0x105   : > { %v219_v46 = vpop.permute.xlu0 %218 }
 0x106   : > { %v249_v51 = vsel %vm248_vm4, %v152_v25, %v219_v46 }
 0x109   : > { %v221_v47 = vpop.permute.xlu1 %220  ;;  %v227_v48 = vpop.permute.xlu0 %226 }
 0x10a   : > { %v252_v52 = vsel %vm251_vm5, %v249_v51, %v227_v48  ;;  %v250_v57 = vsel %vm248_vm4, %v153_v32, %v221_v47 }
 0x10d   : > { %v229_v49 = vpop.permute.xlu1 %228  ;;  %v235_v50 = vpop.permute.xlu0 %234 }
 0x10e   : > { %v255_v53 = vsel %vm254_vm6, %v252_v52, %v235_v50  ;;  %v253_v58 = vsel %vm251_vm5, %v250_v57, %v229_v49 }
 0x111   : > { %v237_v54 = vpop.permute.xlu1 %236  ;;  %v243_v55 = vpop.permute.xlu0 %242 }
 0x112   : > { %v258_v56 = vsel %vm257_vm7, %v255_v53, %v243_v55  ;;  %v256_v59 = vsel %vm254_vm6, %v253_v58, %v237_v54 }
 0x113   : > { %453 = vmatprep.mubr.msk.f32.mxu0 %vm266_vm8, %v258_v56 }
 0x115   : > { %v245_v60 = vpop.permute.xlu1 %244 }
 0x116   : > { %v259_v61 = vsel %vm257_vm7, %v256_v59, %v245_v60 }
 0x117   : > { %454 = vmatmul.mubr.msk.f32.vlgmr.msra.gmra.mrb[0].mxu0 %vm266_vm8, %v259_v61 }
 0x1ea   : > { %v455_v62 = vpop.f32.mrb[0].mxu0 }
 0x1eb   : > { %v353_v63 = vmax.f32 %v455_v62, 0.0  ;;  %v343_v0 = vpop.f32.mrb[1].mxu0 }
 0x1ec   : > { %v352_v1 = vmax.f32 %v343_v0, 0.0 }
 0x1ed   : > { %v355_v3 = vsel %vm151_vm0, %v176_v34, %v353_v63 }
 0x1ee   : > { %v354_v2 = vsel %vm151_vm0, %v548_v26, %v352_v1  ;;  %358 = vst.msk [vmem:[%s145_s6 + $0x8] sm:$0xff] %vm356_vm9, %v355_v3 }
 0x1ef   : > { %357 = vst.msk [vmem:[%s145_s6] sm:$0xff] %vm356_vm9, %v354_v2 }
 0x1f0 PF: > { %s12_s9 = sadd.s32 1, %s492_s9  }
 0x1f1   : > { %p9_p4 = scmp.ge.s32.totalorder %s12_s9, 4  }
 0x1f3   :  { %11 = sbr.rel (!%p9_p4) target bundleno = 1 (0x1), region = 58 }

</bundles_post_ra>
